<compile_context>
chip_gen: v5e
topology: v5e:2x2
jax: 0.10.0
libtpu: 0.0.40
codegen_flags: <defaults>
</compile_context>

<pallas_src>
import jax
import jax.numpy as jnp
from jax.experimental import pallas as pl
from jax.experimental.pallas import tpu as pltpu

_H1, _H2, _OUT = 24, 12, 3


def _round_up(n, m):
    return ((n + m - 1) // m) * m


def _choose_tiling(B, max_tile_b):
    """Balanced batch tiling: tiles <= max_tile_b, padding waste < 8 rows/tile."""
    max_tile_b = max(8, max_tile_b)
    n_tiles = max(1, -(-B // max_tile_b))          # cdiv
    tile_b = _round_up(max(-(-B // n_tiles), 8), 8)  # balanced, 8-row granule
    return n_tiles, tile_b, n_tiles * tile_b


def _mlp_kernel(x_ref, w1_ref, b1_ref, w2_ref, b2_ref, w3_ref, b3_ref, o_ref):
    # Layer 1: Linear(input_n -> 24) + ReLU   (dropout = identity in eval mode)
    h1 = jnp.dot(x_ref[...], w1_ref[...], preferred_element_type=jnp.float32)
    h1 = jnp.maximum(h1 + b1_ref[...], 0.0)
    # Layer 2: Linear(24 -> 12) + ReLU        (dropout = identity in eval mode)
    h2 = jnp.dot(h1, w2_ref[...], preferred_element_type=jnp.float32)
    h2 = jnp.maximum(h2 + b2_ref[...], 0.0)
    # Layer 3: Linear(12 -> 3); stored straight into the (tile_b, 3) output
    # block (full rows -> contiguous HBM destination per tile).
    o_ref[...] = (
        jnp.dot(h2, w3_ref[...], preferred_element_type=jnp.float32) + b3_ref[...]
    )


def super_ai_forward(x, params, *, tile_b=2048):
    """Fused forward pass of superAi (eval mode).

    x: (B, input_n) float array
    params: dict with w1 (input_n,24), b1 (1,24), w2 (24,12), b2 (1,12),
            w3 (12,3), b3 (1,3)   -- weights stored as (in, out), i.e. the
            transpose of PyTorch's nn.Linear weight layout.
    returns: (B, 3) float32
    """
    x = x.astype(jnp.float32)
    B, input_n = x.shape
    w1, b1 = params["w1"], params["b1"]
    w2, b2 = params["w2"], params["b2"]
    w3, b3 = params["w3"], params["b3"]

    n_tiles, tile_b, b_pad = _choose_tiling(B, tile_b)
    if b_pad != B:
        # Only pad when needed (pads < 8*n_tiles rows; avoids the old full-copy
        # pad to a power-of-two multiple of the tile).
        x = jnp.pad(x, ((0, b_pad - B), (0, 0)))

    const = lambda shape: pl.BlockSpec(shape, lambda i: (0, 0))  # VMEM-resident

    out = pl.pallas_call(
        _mlp_kernel,
        out_shape=jax.ShapeDtypeStruct((b_pad, _OUT), jnp.float32),
        grid=(n_tiles,),
        in_specs=[
            pl.BlockSpec((tile_b, input_n), lambda i: (i, 0)),   # x: tiled over batch
            const(w1.shape), const(b1.shape),
            const(w2.shape), const(b2.shape),
            const(w3.shape), const(b3.shape),
        ],
        out_specs=pl.BlockSpec((tile_b, _OUT), lambda i: (i, 0)),
        compiler_params=pltpu.CompilerParams(
            dimension_semantics=("parallel",),                   # megacore on v7x
        ),
    )(x, w1, b1, w2, b2, w3, b3)

    return out if b_pad == B else out[:B]


def init_params(key, input_n):
    """Deterministic init mirroring nn.Linear's U(-1/sqrt(fan_in), 1/sqrt(fan_in))."""
    ks = jax.random.split(key, 6)

    def linear(kw, kb, fan_in, fan_out):
        bound = 1.0 / jnp.sqrt(jnp.float32(fan_in))
        w = jax.random.uniform(kw, (fan_in, fan_out), jnp.float32, -bound, bound)
        b = jax.random.uniform(kb, (1, fan_out), jnp.float32, -bound, bound)
        return w, b

    w1, b1 = linear(ks[0], ks[1], input_n, _H1)
    w2, b2 = linear(ks[2], ks[3], _H1, _H2)
    w3, b3 = linear(ks[4], ks[5], _H2, _OUT)
    return {"w1": w1, "b1": b1, "w2": w2, "b2": b2, "w3": w3, "b3": b3}


def _reference_forward(x, p):
    h1 = jnp.maximum(x @ p["w1"] + p["b1"], 0.0)
    h2 = jnp.maximum(h1 @ p["w2"] + p["b2"], 0.0)
    return h2 @ p["w3"] + p["b3"]


if __name__ == "__main__":
    key = jax.random.PRNGKey(0)
    k_x, k_p, k_x2 = jax.random.split(key, 3)

    # Small demo shape (matches the module: input_n features -> 3 outputs).
    batch, input_n = 8, 32
    params = init_params(k_p, input_n)

    x = jax.random.normal(k_x, (batch, input_n), dtype=jnp.float32)
    out = jax.block_until_ready(super_ai_forward(x, params))
    ref = _reference_forward(x, params)
    assert out.shape == (batch, _OUT)
    assert jnp.allclose(out, ref, atol=1e-5, rtol=1e-5)

    # Also exercise the multi-tile / ragged-batch path (balanced tiles + padding).
    batch2 = 2500
    x2 = jax.random.normal(k_x2, (batch2, input_n), dtype=jnp.float32)
    out2 = jax.block_until_ready(super_ai_forward(x2, params, tile_b=1024))
    ref2 = _reference_forward(x2, params)
    assert out2.shape == (batch2, _OUT)
    assert jnp.allclose(out2, ref2, atol=1e-5, rtol=1e-5)

    print("KERNEL_OK")
</pallas_src>

<mosaic_0001>
module attributes {stable_mosaic.version = 11 : i64} {
  func.func @_mlp_kernel(%arg0: i32, %arg1: memref<8x32xf32, #tpu.memory_space<vmem>>, %arg2: memref<32x24xf32, #tpu.memory_space<vmem>>, %arg3: memref<1x24xf32, #tpu.memory_space<vmem>>, %arg4: memref<24x12xf32, #tpu.memory_space<vmem>>, %arg5: memref<1x12xf32, #tpu.memory_space<vmem>>, %arg6: memref<12x3xf32, #tpu.memory_space<vmem>>, %arg7: memref<1x3xf32, #tpu.memory_space<vmem>>, %arg8: memref<8x3xf32, #tpu.memory_space<vmem>>) attributes {dimension_semantics = [#tpu.dimension_semantics<parallel>], iteration_bounds = array<i64: 1>, scalar_prefetch = 0 : i64, scratch_operands = 0 : i64, tpu.core_type = #tpu.core_type<tc>, window_params = [{transform_indices = @transform_0, window_bounds = array<i64: 8, 32>}, {pipeline_mode = #tpu.pipeline_mode<synchronous>, transform_indices = @transform_1, window_bounds = array<i64: 32, 24>}, {pipeline_mode = #tpu.pipeline_mode<synchronous>, transform_indices = @transform_2, window_bounds = array<i64: 1, 24>}, {pipeline_mode = #tpu.pipeline_mode<synchronous>, transform_indices = @transform_3, window_bounds = array<i64: 24, 12>}, {pipeline_mode = #tpu.pipeline_mode<synchronous>, transform_indices = @transform_4, window_bounds = array<i64: 1, 12>}, {pipeline_mode = #tpu.pipeline_mode<synchronous>, transform_indices = @transform_5, window_bounds = array<i64: 12, 3>}, {pipeline_mode = #tpu.pipeline_mode<synchronous>, transform_indices = @transform_6, window_bounds = array<i64: 1, 3>}, {transform_indices = @transform_7, window_bounds = array<i64: 8, 3>}]} {
    %c0 = arith.constant 0 : index
    %c0_0 = arith.constant 0 : index
    %0 = vector.load %arg1[%c0, %c0_0] : memref<8x32xf32, #tpu.memory_space<vmem>>, vector<8x32xf32>
    %c0_1 = arith.constant 0 : index
    %c0_2 = arith.constant 0 : index
    %1 = vector.load %arg2[%c0_1, %c0_2] : memref<32x24xf32, #tpu.memory_space<vmem>>, vector<32x24xf32>
    %cst = arith.constant dense<0.000000e+00> : vector<8x24xf32>
    %2 = tpu.matmul %0, %1, %cst {dimension_numbers = #tpu.dot_dimension_numbers<[1], [0], [0], [1], [0, 0, 1, 1], [], []>} : vector<8x32xf32>, vector<32x24xf32>, vector<8x24xf32> -> vector<8x24xf32>
    %c0_3 = arith.constant 0 : index
    %c0_4 = arith.constant 0 : index
    %3 = vector.load %arg3[%c0_3, %c0_4] : memref<1x24xf32, #tpu.memory_space<vmem>>, vector<1x24xf32>
    %4 = vector.broadcast %3 : vector<1x24xf32> to vector<8x24xf32>
    %5 = arith.addf %2, %4 : vector<8x24xf32>
    %cst_5 = arith.constant 0.000000e+00 : f32
    %6 = vector.broadcast %cst_5 : f32 to vector<8x24xf32>
    %7 = arith.maximumf %5, %6 : vector<8x24xf32>
    %c0_6 = arith.constant 0 : index
    %c0_7 = arith.constant 0 : index
    %8 = vector.load %arg4[%c0_6, %c0_7] : memref<24x12xf32, #tpu.memory_space<vmem>>, vector<24x12xf32>
    %cst_8 = arith.constant dense<0.000000e+00> : vector<8x12xf32>
    %9 = tpu.matmul %7, %8, %cst_8 {dimension_numbers = #tpu.dot_dimension_numbers<[1], [0], [0], [1], [0, 0, 1, 1], [], []>} : vector<8x24xf32>, vector<24x12xf32>, vector<8x12xf32> -> vector<8x12xf32>
    %c0_9 = arith.constant 0 : index
    %c0_10 = arith.constant 0 : index
    %10 = vector.load %arg5[%c0_9, %c0_10] : memref<1x12xf32, #tpu.memory_space<vmem>>, vector<1x12xf32>
    %11 = vector.broadcast %10 : vector<1x12xf32> to vector<8x12xf32>
    %12 = arith.addf %9, %11 : vector<8x12xf32>
    %cst_11 = arith.constant 0.000000e+00 : f32
    %13 = vector.broadcast %cst_11 : f32 to vector<8x12xf32>
    %14 = arith.maximumf %12, %13 : vector<8x12xf32>
    %c0_12 = arith.constant 0 : index
    %c0_13 = arith.constant 0 : index
    %15 = vector.load %arg6[%c0_12, %c0_13] : memref<12x3xf32, #tpu.memory_space<vmem>>, vector<12x3xf32>
    %cst_14 = arith.constant dense<0.000000e+00> : vector<8x3xf32>
    %16 = tpu.matmul %14, %15, %cst_14 {dimension_numbers = #tpu.dot_dimension_numbers<[1], [0], [0], [1], [0, 0, 1, 1], [], []>} : vector<8x12xf32>, vector<12x3xf32>, vector<8x3xf32> -> vector<8x3xf32>
    %c0_15 = arith.constant 0 : index
    %c0_16 = arith.constant 0 : index
    %17 = vector.load %arg7[%c0_15, %c0_16] : memref<1x3xf32, #tpu.memory_space<vmem>>, vector<1x3xf32>
    %18 = vector.broadcast %17 : vector<1x3xf32> to vector<8x3xf32>
    %19 = arith.addf %16, %18 : vector<8x3xf32>
    %c0_17 = arith.constant 0 : index
    %c0_18 = arith.constant 0 : index
    %20 = vector.load %arg8[%c0_17, %c0_18] : memref<8x3xf32, #tpu.memory_space<vmem>>, vector<8x3xf32>
    tpu.vector_store %arg8[%c0_17, %c0_18], %19 {strides = array<i32>} : memref<8x3xf32, #tpu.memory_space<vmem>>, vector<8x3xf32>,
    return
  }
  func.func @transform_0(%arg0: i32) -> (i32, i32) {
    %c0_i32 = arith.constant 0 : i32
    %c0_i32_0 = arith.constant 0 : i32
    return %arg0, %c0_i32 : i32, i32
  }
  func.func @transform_1(%arg0: i32) -> (i32, i32) {
    %c0_i32 = arith.constant 0 : i32
    %c0_i32_0 = arith.constant 0 : i32
    %c0_i32_1 = arith.constant 0 : i32
    return %c0_i32, %c0_i32_0 : i32, i32
  }
  func.func @transform_2(%arg0: i32) -> (i32, i32) {
    %c0_i32 = arith.constant 0 : i32
    %c0_i32_0 = arith.constant 0 : i32
    %c0_i32_1 = arith.constant 0 : i32
    return %c0_i32, %c0_i32_0 : i32, i32
  }
  func.func @transform_3(%arg0: i32) -> (i32, i32) {
    %c0_i32 = arith.constant 0 : i32
    %c0_i32_0 = arith.constant 0 : i32
    %c0_i32_1 = arith.constant 0 : i32
    return %c0_i32, %c0_i32_0 : i32, i32
  }
  func.func @transform_4(%arg0: i32) -> (i32, i32) {
    %c0_i32 = arith.constant 0 : i32
    %c0_i32_0 = arith.constant 0 : i32
    %c0_i32_1 = arith.constant 0 : i32
    return %c0_i32, %c0_i32_0 : i32, i32
  }
  func.func @transform_5(%arg0: i32) -> (i32, i32) {
    %c0_i32 = arith.constant 0 : i32
    %c0_i32_0 = arith.constant 0 : i32
    %c0_i32_1 = arith.constant 0 : i32
    return %c0_i32, %c0_i32_0 : i32, i32
  }
  func.func @transform_6(%arg0: i32) -> (i32, i32) {
    %c0_i32 = arith.constant 0 : i32
    %c0_i32_0 = arith.constant 0 : i32
    %c0_i32_1 = arith.constant 0 : i32
    return %c0_i32, %c0_i32_0 : i32, i32
  }
  func.func @transform_7(%arg0: i32) -> (i32, i32) {
    %c0_i32 = arith.constant 0 : i32
    %c0_i32_0 = arith.constant 0 : i32
    return %arg0, %c0_i32 : i32, i32
  }
}

</mosaic_0001>

<bundles_post_ra>
// kernel: tpu_custom_call.1
= control target key start
LH: loop header
LB: loop body
LE: loop exit
PB: predicated region body
PF: predicated region fallthrough
CT: control target
= control target key end

     0   :  { %vm35_vm0 = vcmask 261120   ;;  %vm67_vm1 = vcmask 195584   ;;  %vm102_vm2 = vcmask 1043456   ;;  %vm98_vm3 = vcmask 97280   ;;  %s221_s1 = inlined_call_operand.vmem [shape: f32[32,24], index: 1, kind: input, shape index: {}]   ;;  %s222_s2 = inlined_call_operand.vmem [shape: f32[1,24], index: 2, kind: input, shape index: {}]   ;;  %s223_s0 = inlined_call_operand.vmem [shape: f32[8,32], index: 0, kind: input, shape index: {}]   ;;  %s224_s4 = inlined_call_operand.vmem [shape: f32[1,12], index: 4, kind: input, shape index: {}]   ;;  %s225_s3 = inlined_call_operand.vmem [shape: f32[24,12], index: 3, kind: input, shape index: {}]   ;;  %s226_s6 = inlined_call_operand.vmem [shape: f32[1,3], index: 6, kind: input, shape index: {}]   ;;  %s227_s5 = inlined_call_operand.vmem [shape: f32[12,3], index: 5, kind: input, shape index: {}]   ;;  %s228_s7 = inlined_call_operand.vmem [shape: f32[8,3], index: 7, kind: output, shape index: {}]  }
   0x1   :  { %v30_v0 = vld [vmem:[%s221_s1 + $0x18] sm:$0xff]  ;;  %v29_v1 = vld [vmem:[%s221_s1 + $0x10] sm:$0xff]  ;;  %v28_v2 = vld [vmem:[%s221_s1 + $0x8] sm:$0xff]  ;;  %vm126_vm4 = vcmask 23552  }
   0x2   :  { %51 = vmatpush.msra.mxu0 %v30_v0  ;;  %v27_v3 = vld [vmem:[%s221_s1] sm:$0xff]  ;;  %v62_v5 = vld [vmem:[%s225_s3 + $0x10] sm:$0xff]  ;;  %v61_v6 = vld [vmem:[%s225_s3 + $0x8] sm:$0xff] }
   0x3   :  { %v26_v4 = vld [vmem:[%s223_s0] sm:$0xff]  ;;  %84 = vmatpush.msra.mxu1 %v62_v5  ;;  %v93_v12 = vld [vmem:[%s227_s5 + $0x8] sm:$0xf] }
   0x4   :  { %52 = vmatpush.msra.mxu0 %v29_v1  ;;  %v60_v7 = vld [vmem:[%s225_s3] sm:$0xff]  ;;  %134 = vmatpush.msk.msra.mxu2 %vm102_vm2, %v93_v12 }
   0x5   :  { %85 = vmatpush.msra.mxu1 %v61_v6  ;;  %v136_v8 = vld [vmem:[%s222_s2] ss:$0 sm:$0xff] }
   0x6   :  { %53 = vmatpush.msra.mxu0 %v28_v2  ;;  %v92_v13 = vld [vmem:[%s227_s5] sm:$0xff] }
   0x7   :  { %86 = vmatpush.msra.mxu1 %v60_v7  ;;  %121 = vmatpush.msra.mxu2 %v92_v13  ;;  %v137_v14 = vld [vmem:[%s224_s4] ss:$0 sm:$0xff] }
   0x8   :  { %54 = vmatpush.msra.mxu0 %v27_v3  ;;  %v138_v18 = vld [vmem:[%s226_s6] ss:$0 sm:$0xff] }
   0x9   :  { %132 = vmatmul.msk.f32.vlgmr.msra.gmra.mxu0 %vm35_vm0, %v26_v4 }
  0x86   :  { %v56_v9 = vpop.f32.mrf.mxu0 }
  0x87   :  { %v57_v10 = vadd.f32 %v136_v8, %v56_v9 }
  0x89   :  { %v59_v11 = vmax.f32 %v57_v10, 0.0 }
  0x8b   :  { %133 = vmatmul.msk.f32.vlgmr.msra.gmra.mxu1 %vm67_vm1, %v59_v11 }
 0x108   :  { %v88_v15 = vpop.f32.mrf.mxu1 }
 0x109   :  { %v89_v16 = vadd.f32 %v137_v14, %v88_v15 }
 0x10b   :  { %v91_v17 = vmax.f32 %v89_v16, 0.0 }
 0x10d   :  { %135 = vmatmul.msk.f32.vlgmr.msra.gmra.mxu2 %vm98_vm3, %v91_v17 }
 0x190   :  { %v123_v19 = vpop.f32.mrf.mxu2 }
 0x191   :  { %v124_v20 = vadd.f32 %v138_v18, %v123_v19 }
 0x193   :  { %127 = vst.msk [vmem:[%s228_s7] sm:$0xff] %vm126_vm4, %v124_v20 }

</bundles_post_ra>
